<compile_context>
chip_gen: v5e
topology: v5e:2x2
jax: 0.10.0
libtpu: 0.0.40
codegen_flags: <defaults>
</compile_context>

<pallas_src>
import jax
import jax.numpy as jnp
from jax.experimental import pallas as pl
from jax.experimental.pallas import tpu as pltpu


def _round_up(x, m):
    return (x + m - 1) // m * m


def _cdiv(a, b):
    return (a + b - 1) // b


def _device_kind():
    try:
        return jax.devices()[0].device_kind.lower()
    except Exception:
        return ""


def _vmem_capacity_bytes():
    """Per-TensorCore VMEM capacity: query hardware, conservative fallback."""
    try:
        cap = getattr(pltpu.get_tpu_info(), "vmem_capacity_bytes", None)
        if cap:
            return int(cap)
    except Exception:
        pass
    kind = _device_kind()
    if "v7" in kind:
        return 64 * 1024 * 1024
    if "v5" in kind or "v6" in kind:
        return 128 * 1024 * 1024
    return 64 * 1024 * 1024  # unknown chip: be conservative


def _mxu_pad_multiple():
    """Pad hidden dim to the MXU tile width: 256 on v6e/v7x, 128 otherwise."""
    kind = _device_kind()
    return 256 if ("v6" in kind or "v7" in kind) else 128


# --------------------------------------------------------------------------
# Kernels
# --------------------------------------------------------------------------

def _value_head_resident_kernel(x_ref, w1_ref, b1_ref, w2_ref, b2_ref,
                                w3_ref, b3_ref, o_ref):
    # x_ref : (tm, Hp) native dtype (streams over rows)
    # w1/w2 : (Hp, Hp) gemm dtype (resident)   b1/b2: (1, Hp) f32
    # w3    : (1, Hp)  f32                     b3   : (1, 1)  f32
    # o_ref : (tm, 1)  f32
    gemm_dtype = w1_ref.dtype
    x = x_ref[...].astype(gemm_dtype)

    h = jnp.dot(x, w1_ref[...], preferred_element_type=jnp.float32) + b1_ref[...]
    h = jnp.maximum(h, 0.0)                      # Dropout = identity at eval

    h = jnp.dot(h.astype(gemm_dtype), w2_ref[...],
                preferred_element_type=jnp.float32) + b2_ref[...]
    h = jnp.maximum(h, 0.0)                      # Dropout = identity at eval

    # H -> 1 projection on the VPU/XLU (keeps the MXU free for the next tile).
    o_ref[...] = jnp.sum(h * w3_ref[...], axis=-1, keepdims=True) + b3_ref[...]


def _value_head_streaming_kernel(x_ref, w1c_ref, b1c_ref, w2c_ref, b2_ref,
                                 w3_ref, b3_ref, o_ref, acc_ref):
    # Grid = (row tiles ["parallel"], hidden column blocks ["arbitrary"]).
    # x_ref  : (tm, Hp)  resident across the column axis
    # w1c    : (Hp, tc)  column block of W1       b1c: (1, tc) f32
    # w2c    : (tc, Hp)  row block of W2          b2 : (1, Hp) f32
    # acc_ref: (tm, Hp)  f32 accumulator for the second GEMM
    c = pl.program_id(1)
    gemm_dtype = w1c_ref.dtype

    @pl.when(c == 0)
    def _():
        acc_ref[...] = jnp.zeros_like(acc_ref)

    x = x_ref[...].astype(gemm_dtype)
    # h1 column block; ReLU/bias are per-column so this is exact.
    h1 = jnp.dot(x, w1c_ref[...], preferred_element_type=jnp.float32) + b1c_ref[...]
    h1 = jnp.maximum(h1, 0.0)                    # Dropout = identity at eval
    acc_ref[...] += jnp.dot(h1.astype(gemm_dtype), w2c_ref[...],
                            preferred_element_type=jnp.float32)

    @pl.when(c == pl.num_programs(1) - 1)
    def _():
        h2 = jnp.maximum(acc_ref[...] + b2_ref[...], 0.0)   # Dropout = identity
        o_ref[...] = jnp.sum(h2 * w3_ref[...], axis=-1, keepdims=True) + b3_ref[...]


# --------------------------------------------------------------------------
# Wrapper
# --------------------------------------------------------------------------

def value_head_forward(hidden_states, params, *, block_rows=None, block_cols=None,
                       gemm_dtype=jnp.bfloat16, force_weight_streaming=False):
    """ValueHead forward: (B, S, H) float -> (B, S, 1) float32.

    gemm_dtype=bfloat16 (default): bf16 MXU GEMMs with f32 accumulation.
    gemm_dtype=float32: debug/parity mode with the fp32 PyTorch module
    (doubles resident weight VMEM and runs far below bf16 MXU rate).
    """
    w1, b1, w2, b2, w3, b3 = params
    B, S, H = hidden_states.shape
    rows = B * S

    pad = _mxu_pad_multiple()
    Hp = _round_up(H, pad)
    gemm_bytes = jnp.dtype(gemm_dtype).itemsize
    x_bytes = jnp.dtype(hidden_states.dtype).itemsize
    vmem_cap = _vmem_capacity_bytes()
    multi_tc = "v7" in _device_kind()

    # Stream x in its native dtype (no fp32 HBM copy in the wrapper).
    x2d = hidden_states.reshape(rows, H)

    # PyTorch Linear weight is (out, in); transpose once so kernels do x @ W.
    def prep_w(w):
        wt = w.T.astype(jnp.float32)
        if Hp != H:
            wt = jnp.pad(wt, ((0, Hp - H), (0, Hp - H)))
        return wt.astype(gemm_dtype)

    def prep_b(b):
        b = b.astype(jnp.float32)
        if Hp != H:
            b = jnp.pad(b, (0, Hp - H))
        return b.reshape(1, Hp)

    w1_t, w2_t = prep_w(w1), prep_w(w2)
    b1_r, b2_r = prep_b(b1), prep_b(b2)
    w3_r = w3.reshape(1, H).astype(jnp.float32)
    if Hp != H:
        w3_r = jnp.pad(w3_r, ((0, 0), (0, Hp - H)))
    b3_r = b3.reshape(1, 1).astype(jnp.float32)

    def invoke(single_buffer_weights):
        weight_bufs = 1 if single_buffer_weights else 2
        resident_weight_bytes = weight_bufs * 2 * Hp * Hp * gemm_bytes
        # Stream weight blocks instead of keeping them resident when the
        # resident weights alone would eat >60% of VMEM (v7x at H>=~3K bf16).
        use_streaming = force_weight_streaming or (
            resident_weight_bytes > 0.6 * vmem_cap)

        def const_spec(shape):
            # Constant-index operands never re-fetch; single-buffer them so the
            # resident footprint is halved.  Falls back (see below) if the
            # installed Pallas rejects pipeline_mode.
            if single_buffer_weights:
                return pl.BlockSpec(shape, lambda *_: (0,) * len(shape),
                                    pipeline_mode=pl.Buffered(buffer_count=1))
            return pl.BlockSpec(shape, lambda *_: (0,) * len(shape))

        budget = int(0.9 * vmem_cap)
        small_bytes = weight_bufs * (3 * Hp + 1) * 4   # b1, b2, w3, b3 (f32)

        if not use_streaming:
            fixed = resident_weight_bytes + small_bytes
            tm = 8
            for cand in (1024, 512, 256, 128, 64, 32, 16, 8):
                per_tile = (2 * cand * Hp * x_bytes    # x tile, double-buffered
                            + 3 * cand * Hp * 4        # f32 intermediates / casts
                            + 2 * cand * 4)            # out tile, double-buffered
                if fixed + per_tile <= budget:
                    tm = cand
                    break
            if block_rows is not None:
                assert block_rows % 8 == 0, "block_rows must be a multiple of 8"
                tm = block_rows
            else:
                tm = min(tm, _round_up(rows, 8))
                if multi_tc and rows >= 16:
                    # Keep >=2 "parallel" steps so both v7x TensorCores get work.
                    tm = min(tm, _round_up(_cdiv(rows, 2), 8))

            rows_p = _round_up(rows, tm)
            grid = (rows_p // tm,)

            kernel = _value_head_resident_kernel
            in_specs = [
                pl.BlockSpec((tm, Hp), lambda i: (i, 0)),   # x (streams over rows)
                const_spec((Hp, Hp)),                       # w1 (resident)
                const_spec((1, Hp)),                        # b1
                const_spec((Hp, Hp)),                       # w2 (resident)
                const_spec((1, Hp)),                        # b2
                const_spec((1, Hp)),                        # w3 row
                const_spec((1, 1)),                         # b3
            ]
            out_spec = pl.BlockSpec((tm, 1), lambda i: (i, 0))
            scratch = []
            dim_sem = ("parallel",)
            vmem_needed = fixed + 2 * tm * Hp * x_bytes + 3 * tm * Hp * 4 + 2 * tm * 4
        else:
            # Column-block width for the streamed weights (must divide Hp).
            if block_cols is not None:
                assert block_cols % 128 == 0 and Hp % block_cols == 0
                tc = block_cols
            else:
                tc = 128
                for cand in (512, 256, 128):
                    if Hp % cand == 0:
                        tc = cand
                        break

            # Streamed W1 column block + W2 row block (double-buffered) + b1 block.
            wblk = 2 * (Hp * tc + tc * Hp) * gemm_bytes + 2 * tc * 4
            fixed = wblk + weight_bufs * (2 * Hp + 1) * 4   # b2, w3, b3
            tm = 8
            for cand in (512, 256, 128, 64, 32, 16, 8):
                per_tile = (2 * cand * Hp * x_bytes    # x tile, double-buffered
                            + cand * Hp * 4            # f32 accumulator scratch
                            + 2 * cand * Hp * 4        # f32 temporaries / casts
                            + 2 * cand * 4)            # out tile
                if fixed + per_tile <= budget:
                    tm = cand
                    break
            if block_rows is not None:
                assert block_rows % 8 == 0, "block_rows must be a multiple of 8"
                tm = block_rows
            else:
                tm = min(tm, _round_up(rows, 8))
                if multi_tc and rows >= 16:
                    tm = min(tm, _round_up(_cdiv(rows, 2), 8))

            rows_p = _round_up(rows, tm)
            grid = (rows_p // tm, Hp // tc)

            kernel = _value_head_streaming_kernel
            in_specs = [
                pl.BlockSpec((tm, Hp), lambda i, c: (i, 0)),   # x (resident over c)
                pl.BlockSpec((Hp, tc), lambda i, c: (0, c)),   # w1 column block
                pl.BlockSpec((1, tc), lambda i, c: (0, c)),    # b1 block
                pl.BlockSpec((tc, Hp), lambda i, c: (c, 0)),   # w2 row block
                const_spec((1, Hp)),                           # b2
                const_spec((1, Hp)),                           # w3 row
                const_spec((1, 1)),                            # b3
            ]
            out_spec = pl.BlockSpec((tm, 1), lambda i, c: (i, 0))
            scratch = [pltpu.VMEM((tm, Hp), jnp.float32)]
            dim_sem = ("parallel", "arbitrary")
            vmem_needed = (fixed + 2 * tm * Hp * x_bytes + tm * Hp * 4
                           + 2 * tm * Hp * 4 + 2 * tm * 4)

        vmem_limit = int(min(vmem_cap, max(int(1.25 * vmem_needed), 32 * 1024 * 1024)))

        xin = x2d
        if rows_p != rows or Hp != H:
            xin = jnp.pad(xin, ((0, rows_p - rows), (0, Hp - H)))

        out = pl.pallas_call(
            kernel,
            out_shape=jax.ShapeDtypeStruct((rows_p, 1), jnp.float32),
            grid_spec=pltpu.PrefetchScalarGridSpec(
                num_scalar_prefetch=0,
                grid=grid,
                in_specs=in_specs,
                out_specs=out_spec,
                scratch_shapes=scratch,
            ),
            compiler_params=pltpu.CompilerParams(
                dimension_semantics=dim_sem,
                vmem_limit_bytes=vmem_limit,
            ),
        )(xin, w1_t, b1_r, w2_t, b2_r, w3_r, b3_r)

        if single_buffer_weights:
            # Force any compile/launch failure to surface inside this attempt
            # so the fallback below can catch it.
            out = jax.block_until_ready(out)
        return out[:rows]

    try:
        out2d = invoke(True)       # single-buffered constant operands
    except Exception:
        out2d = invoke(False)      # fallback: default double-buffered specs
    return out2d.reshape(B, S, 1)


# --------------------------------------------------------------------------
# Init + reference
# --------------------------------------------------------------------------

def init_value_head_params(key, hidden_size):
    """Deterministic init matching nn.Linear shapes: W (out, in), b (out,)."""
    def linear_init(k, out_f, in_f):
        kw, kb = jax.random.split(k)
        bound = 1.0 / jnp.sqrt(jnp.float32(in_f))
        w = jax.random.uniform(kw, (out_f, in_f), jnp.float32, -bound, bound)
        b = jax.random.uniform(kb, (out_f,), jnp.float32, -bound, bound)
        return w, b

    k1, k2, k3 = jax.random.split(key, 3)
    w1, b1 = linear_init(k1, hidden_size, hidden_size)
    w2, b2 = linear_init(k2, hidden_size, hidden_size)
    w3, b3 = linear_init(k3, 1, hidden_size)
    return (w1, b1, w2, b2, w3, b3)


def _reference(hidden_states, params, gemm_dtype=jnp.float32):
    """Pure-JAX reference.  gemm_dtype mirrors the kernel's GEMM input dtype."""
    w1, b1, w2, b2, w3, b3 = params
    x = hidden_states.astype(jnp.float32)

    def mm(a, w):
        return jnp.dot(a.astype(gemm_dtype), w.T.astype(gemm_dtype),
                       preferred_element_type=jnp.float32)

    h = jnp.maximum(mm(x, w1) + b1, 0.0)
    h = jnp.maximum(mm(h, w2) + b2, 0.0)
    return jnp.dot(h, w3.T.astype(jnp.float32),
                   preferred_element_type=jnp.float32) + b3


if __name__ == "__main__":
    key = jax.random.PRNGKey(0)
    k_params, k_x = jax.random.split(key)

    batch, seq, hidden = 2, 8, 32
    params = init_value_head_params(k_params, hidden)
    hidden_states = jax.random.normal(k_x, (batch, seq, hidden), dtype=jnp.float32)

    ref_bf16 = _reference(hidden_states, params, gemm_dtype=jnp.bfloat16)
    ref_f32 = _reference(hidden_states, params, gemm_dtype=jnp.float32)

    # Default (resident-weight, bf16-GEMM) path.
    out = jax.block_until_ready(value_head_forward(hidden_states, params))
    assert out.shape == (batch, seq, 1), out.shape
    assert jnp.allclose(out, ref_bf16, atol=1e-3, rtol=1e-3), \
        float(jnp.max(jnp.abs(out - ref_bf16)))
    assert jnp.allclose(out, ref_f32, atol=5e-2, rtol=5e-2), \
        float(jnp.max(jnp.abs(out - ref_f32)))

    # Weight-streaming (large-H / v7x) path, forced at small shapes to test it.
    out_stream = jax.block_until_ready(value_head_forward(
        hidden_states, params, force_weight_streaming=True, block_cols=128))
    assert out_stream.shape == (batch, seq, 1), out_stream.shape
    assert jnp.allclose(out_stream, ref_bf16, atol=1e-3, rtol=1e-3), \
        float(jnp.max(jnp.abs(out_stream - ref_bf16)))

    # fp32 parity (debug) path matches the fp32 reference tightly.
    out_f32 = jax.block_until_ready(value_head_forward(
        hidden_states, params, gemm_dtype=jnp.float32))
    assert jnp.allclose(out_f32, ref_f32, atol=1e-5, rtol=1e-5), \
        float(jnp.max(jnp.abs(out_f32 - ref_f32)))

    print("KERNEL_OK")
</pallas_src>

<mosaic_0001>
module attributes {stable_mosaic.version = 11 : i64} {
  func.func @_value_head_resident_kernel(%arg0: i32, %arg1: memref<16x128xf32, #tpu.memory_space<vmem>>, %arg2: memref<128x128xbf16, #tpu.memory_space<vmem>>, %arg3: memref<1x128xf32, #tpu.memory_space<vmem>>, %arg4: memref<128x128xbf16, #tpu.memory_space<vmem>>, %arg5: memref<1x128xf32, #tpu.memory_space<vmem>>, %arg6: memref<1x128xf32, #tpu.memory_space<vmem>>, %arg7: memref<1x1xf32, #tpu.memory_space<vmem>>, %arg8: memref<16x1xf32, #tpu.memory_space<vmem>>) attributes {dimension_semantics = [#tpu.dimension_semantics<parallel>], iteration_bounds = array<i64: 1>, scalar_prefetch = 0 : i64, scratch_operands = 0 : i64, tpu.core_type = #tpu.core_type<tc>, window_params = [{transform_indices = @transform_0, window_bounds = array<i64: 16, 128>}, {pipeline_mode = #tpu.pipeline_mode<synchronous>, transform_indices = @transform_1, window_bounds = array<i64: 128, 128>}, {pipeline_mode = #tpu.pipeline_mode<synchronous>, transform_indices = @transform_2, window_bounds = array<i64: 1, 128>}, {pipeline_mode = #tpu.pipeline_mode<synchronous>, transform_indices = @transform_3, window_bounds = array<i64: 128, 128>}, {pipeline_mode = #tpu.pipeline_mode<synchronous>, transform_indices = @transform_4, window_bounds = array<i64: 1, 128>}, {pipeline_mode = #tpu.pipeline_mode<synchronous>, transform_indices = @transform_5, window_bounds = array<i64: 1, 128>}, {pipeline_mode = #tpu.pipeline_mode<synchronous>, transform_indices = @transform_6, window_bounds = array<i64: 1, 1>}, {transform_indices = @transform_7, window_bounds = array<i64: 16, 1>}]} {
    %c0 = arith.constant 0 : index
    %c0_0 = arith.constant 0 : index
    %0 = vector.load %arg1[%c0, %c0_0] : memref<16x128xf32, #tpu.memory_space<vmem>>, vector<16x128xf32>
    %1 = arith.truncf %0 : vector<16x128xf32> to vector<16x128xbf16>
    %c0_1 = arith.constant 0 : index
    %c0_2 = arith.constant 0 : index
    %2 = vector.load %arg2[%c0_1, %c0_2] : memref<128x128xbf16, #tpu.memory_space<vmem>>, vector<128x128xbf16>
    %cst = arith.constant dense<0.000000e+00> : vector<16x128xf32>
    %3 = tpu.matmul %1, %2, %cst {dimension_numbers = #tpu.dot_dimension_numbers<[1], [0], [0], [1], [0, 0, 1, 1], [], []>} : vector<16x128xbf16>, vector<128x128xbf16>, vector<16x128xf32> -> vector<16x128xf32>
    %c0_3 = arith.constant 0 : index
    %c0_4 = arith.constant 0 : index
    %4 = vector.load %arg3[%c0_3, %c0_4] : memref<1x128xf32, #tpu.memory_space<vmem>>, vector<1x128xf32>
    %5 = vector.broadcast %4 : vector<1x128xf32> to vector<16x128xf32>
    %6 = arith.addf %3, %5 : vector<16x128xf32>
    %cst_5 = arith.constant 0.000000e+00 : f32
    %7 = vector.broadcast %cst_5 : f32 to vector<16x128xf32>
    %8 = arith.maximumf %6, %7 : vector<16x128xf32>
    %9 = arith.truncf %8 : vector<16x128xf32> to vector<16x128xbf16>
    %c0_6 = arith.constant 0 : index
    %c0_7 = arith.constant 0 : index
    %10 = vector.load %arg4[%c0_6, %c0_7] : memref<128x128xbf16, #tpu.memory_space<vmem>>, vector<128x128xbf16>
    %cst_8 = arith.constant dense<0.000000e+00> : vector<16x128xf32>
    %11 = tpu.matmul %9, %10, %cst_8 {dimension_numbers = #tpu.dot_dimension_numbers<[1], [0], [0], [1], [0, 0, 1, 1], [], []>} : vector<16x128xbf16>, vector<128x128xbf16>, vector<16x128xf32> -> vector<16x128xf32>
    %c0_9 = arith.constant 0 : index
    %c0_10 = arith.constant 0 : index
    %12 = vector.load %arg5[%c0_9, %c0_10] : memref<1x128xf32, #tpu.memory_space<vmem>>, vector<1x128xf32>
    %13 = vector.broadcast %12 : vector<1x128xf32> to vector<16x128xf32>
    %14 = arith.addf %11, %13 : vector<16x128xf32>
    %cst_11 = arith.constant 0.000000e+00 : f32
    %15 = vector.broadcast %cst_11 : f32 to vector<16x128xf32>
    %16 = arith.maximumf %14, %15 : vector<16x128xf32>
    %c0_12 = arith.constant 0 : index
    %c0_13 = arith.constant 0 : index
    %17 = vector.load %arg6[%c0_12, %c0_13] : memref<1x128xf32, #tpu.memory_space<vmem>>, vector<1x128xf32>
    %18 = vector.broadcast %17 : vector<1x128xf32> to vector<16x128xf32>
    %19 = arith.mulf %16, %18 : vector<16x128xf32>
    %cst_14 = arith.constant dense<0.000000e+00> : vector<16xf32>
    %20 = vector.multi_reduction <add>, %19, %cst_14 [1] : vector<16x128xf32> to vector<16xf32>
    %21 = vector.shape_cast %20 : vector<16xf32> to vector<16x1xf32>
    %c0_15 = arith.constant 0 : index
    %c0_16 = arith.constant 0 : index
    %22 = vector.load %arg7[%c0_15, %c0_16] : memref<1x1xf32, #tpu.memory_space<vmem>>, vector<1x1xf32>
    %23 = vector.broadcast %22 : vector<1x1xf32> to vector<16x1xf32>
    %24 = arith.addf %21, %23 : vector<16x1xf32>
    %c0_17 = arith.constant 0 : index
    %c0_18 = arith.constant 0 : index
    %25 = vector.load %arg8[%c0_17, %c0_18] : memref<16x1xf32, #tpu.memory_space<vmem>>, vector<16x1xf32>
    tpu.vector_store %arg8[%c0_17, %c0_18], %24 {strides = array<i32>} : memref<16x1xf32, #tpu.memory_space<vmem>>, vector<16x1xf32>,
    return
  }
  func.func @transform_0(%arg0: i32) -> (i32, i32) {
    %c0_i32 = arith.constant 0 : i32
    %c0_i32_0 = arith.constant 0 : i32
    return %arg0, %c0_i32 : i32, i32
  }
  func.func @transform_1(%arg0: i32) -> (i32, i32) {
    %c0_i32 = arith.constant 0 : i32
    %c0_i32_0 = arith.constant 0 : i32
    %c0_i32_1 = arith.constant 0 : i32
    return %c0_i32, %c0_i32_0 : i32, i32
  }
  func.func @transform_2(%arg0: i32) -> (i32, i32) {
    %c0_i32 = arith.constant 0 : i32
    %c0_i32_0 = arith.constant 0 : i32
    %c0_i32_1 = arith.constant 0 : i32
    return %c0_i32, %c0_i32_0 : i32, i32
  }
  func.func @transform_3(%arg0: i32) -> (i32, i32) {
    %c0_i32 = arith.constant 0 : i32
    %c0_i32_0 = arith.constant 0 : i32
    %c0_i32_1 = arith.constant 0 : i32
    return %c0_i32, %c0_i32_0 : i32, i32
  }
  func.func @transform_4(%arg0: i32) -> (i32, i32) {
    %c0_i32 = arith.constant 0 : i32
    %c0_i32_0 = arith.constant 0 : i32
    %c0_i32_1 = arith.constant 0 : i32
    return %c0_i32, %c0_i32_0 : i32, i32
  }
  func.func @transform_5(%arg0: i32) -> (i32, i32) {
    %c0_i32 = arith.constant 0 : i32
    %c0_i32_0 = arith.constant 0 : i32
    %c0_i32_1 = arith.constant 0 : i32
    return %c0_i32, %c0_i32_0 : i32, i32
  }
  func.func @transform_6(%arg0: i32) -> (i32, i32) {
    %c0_i32 = arith.constant 0 : i32
    %c0_i32_0 = arith.constant 0 : i32
    %c0_i32_1 = arith.constant 0 : i32
    return %c0_i32, %c0_i32_0 : i32, i32
  }
  func.func @transform_7(%arg0: i32) -> (i32, i32) {
    %c0_i32 = arith.constant 0 : i32
    %c0_i32_0 = arith.constant 0 : i32
    return %arg0, %c0_i32 : i32, i32
  }
}

module attributes {stable_mosaic.version = 11 : i64} {
  func.func @_value_head_resident_kernel(%arg0: i32, %arg1: memref<16x128xf32, #tpu.memory_space<vmem>>, %arg2: memref<128x128xbf16, #tpu.memory_space<vmem>>, %arg3: memref<1x128xf32, #tpu.memory_space<vmem>>, %arg4: memref<128x128xbf16, #tpu.memory_space<vmem>>, %arg5: memref<1x128xf32, #tpu.memory_space<vmem>>, %arg6: memref<1x128xf32, #tpu.memory_space<vmem>>, %arg7: memref<1x1xf32, #tpu.memory_space<vmem>>, %arg8: memref<16x1xf32, #tpu.memory_space<vmem>>) attributes {dimension_semantics = [#tpu.dimension_semantics<parallel>], iteration_bounds = array<i64: 1>, scalar_prefetch = 0 : i64, scratch_operands = 0 : i64, tpu.core_type = #tpu.core_type<tc>, window_params = [{transform_indices = @transform_0, window_bounds = array<i64: 16, 128>}, {pipeline_mode = #tpu.pipeline_mode<synchronous>, transform_indices = @transform_1, window_bounds = array<i64: 128, 128>}, {pipeline_mode = #tpu.pipeline_mode<synchronous>, transform_indices = @transform_2, window_bounds = array<i64: 1, 128>}, {pipeline_mode = #tpu.pipeline_mode<synchronous>, transform_indices = @transform_3, window_bounds = array<i64: 128, 128>}, {pipeline_mode = #tpu.pipeline_mode<synchronous>, transform_indices = @transform_4, window_bounds = array<i64: 1, 128>}, {pipeline_mode = #tpu.pipeline_mode<synchronous>, transform_indices = @transform_5, window_bounds = array<i64: 1, 128>}, {pipeline_mode = #tpu.pipeline_mode<synchronous>, transform_indices = @transform_6, window_bounds = array<i64: 1, 1>}, {transform_indices = @transform_7, window_bounds = array<i64: 16, 1>}]} {
    %c0 = arith.constant 0 : index
    %c0_0 = arith.constant 0 : index
    %0 = vector.load %arg1[%c0, %c0_0] : memref<16x128xf32, #tpu.memory_space<vmem>>, vector<16x128xf32>
    %1 = arith.truncf %0 : vector<16x128xf32> to vector<16x128xbf16>
    %c0_1 = arith.constant 0 : index
    %c0_2 = arith.constant 0 : index
    %2 = vector.load %arg2[%c0_1, %c0_2] : memref<128x128xbf16, #tpu.memory_space<vmem>>, vector<128x128xbf16>
    %cst = arith.constant dense<0.000000e+00> : vector<16x128xf32>
    %3 = tpu.matmul %1, %2, %cst {dimension_numbers = #tpu.dot_dimension_numbers<[1], [0], [0], [1], [0, 0, 1, 1], [], []>} : vector<16x128xbf16>, vector<128x128xbf16>, vector<16x128xf32> -> vector<16x128xf32>
    %c0_3 = arith.constant 0 : index
    %c0_4 = arith.constant 0 : index
    %4 = vector.load %arg3[%c0_3, %c0_4] : memref<1x128xf32, #tpu.memory_space<vmem>>, vector<1x128xf32>
    %5 = vector.broadcast %4 : vector<1x128xf32> to vector<16x128xf32>
    %6 = arith.addf %3, %5 : vector<16x128xf32>
    %cst_5 = arith.constant 0.000000e+00 : f32
    %7 = vector.broadcast %cst_5 : f32 to vector<16x128xf32>
    %8 = arith.maximumf %6, %7 : vector<16x128xf32>
    %9 = arith.truncf %8 : vector<16x128xf32> to vector<16x128xbf16>
    %c0_6 = arith.constant 0 : index
    %c0_7 = arith.constant 0 : index
    %10 = vector.load %arg4[%c0_6, %c0_7] : memref<128x128xbf16, #tpu.memory_space<vmem>>, vector<128x128xbf16>
    %cst_8 = arith.constant dense<0.000000e+00> : vector<16x128xf32>
    %11 = tpu.matmul %9, %10, %cst_8 {dimension_numbers = #tpu.dot_dimension_numbers<[1], [0], [0], [1], [0, 0, 1, 1], [], []>} : vector<16x128xbf16>, vector<128x128xbf16>, vector<16x128xf32> -> vector<16x128xf32>
    %c0_9 = arith.constant 0 : index
    %c0_10 = arith.constant 0 : index
    %12 = vector.load %arg5[%c0_9, %c0_10] : memref<1x128xf32, #tpu.memory_space<vmem>>, vector<1x128xf32>
    %13 = vector.broadcast %12 : vector<1x128xf32> to vector<16x128xf32>
    %14 = arith.addf %11, %13 : vector<16x128xf32>
    %cst_11 = arith.constant 0.000000e+00 : f32
    %15 = vector.broadcast %cst_11 : f32 to vector<16x128xf32>
    %16 = arith.maximumf %14, %15 : vector<16x128xf32>
    %c0_12 = arith.constant 0 : index
    %c0_13 = arith.constant 0 : index
    %17 = vector.load %arg6[%c0_12, %c0_13] : memref<1x128xf32, #tpu.memory_space<vmem>>, vector<1x128xf32>
    %18 = vector.broadcast %17 : vector<1x128xf32> to vector<16x128xf32>
    %19 = arith.mulf %16, %18 : vector<16x128xf32>
    %cst_14 = arith.constant dense<0.000000e+00> : vector<16xf32>
    %20 = vector.multi_reduction <add>, %19, %cst_14 [1] : vector<16x128xf32> to vector<16xf32>
    %21 = vector.shape_cast %20 : vector<16xf32> to vector<16x1xf32>
    %c0_15 = arith.constant 0 : index
    %c0_16 = arith.constant 0 : index
    %22 = vector.load %arg7[%c0_15, %c0_16] : memref<1x1xf32, #tpu.memory_space<vmem>>, vector<1x1xf32>
    %23 = vector.broadcast %22 : vector<1x1xf32> to vector<16x1xf32>
    %24 = arith.addf %21, %23 : vector<16x1xf32>
    %c0_17 = arith.constant 0 : index
    %c0_18 = arith.constant 0 : index
    %25 = vector.load %arg8[%c0_17, %c0_18] : memref<16x1xf32, #tpu.memory_space<vmem>>, vector<16x1xf32>
    tpu.vector_store %arg8[%c0_17, %c0_18], %24 {strides = array<i32>} : memref<16x1xf32, #tpu.memory_space<vmem>>, vector<16x1xf32>,
    return
  }
  func.func @transform_0(%arg0: i32) -> (i32, i32) {
    %c0_i32 = arith.constant 0 : i32
    %c0_i32_0 = arith.constant 0 : i32
    return %arg0, %c0_i32 : i32, i32
  }
  func.func @transform_1(%arg0: i32) -> (i32, i32) {
    %c0_i32 = arith.constant 0 : i32
    %c0_i32_0 = arith.constant 0 : i32
    %c0_i32_1 = arith.constant 0 : i32
    return %c0_i32, %c0_i32_0 : i32, i32
  }
  func.func @transform_2(%arg0: i32) -> (i32, i32) {
    %c0_i32 = arith.constant 0 : i32
    %c0_i32_0 = arith.constant 0 : i32
    %c0_i32_1 = arith.constant 0 : i32
    return %c0_i32, %c0_i32_0 : i32, i32
  }
  func.func @transform_3(%arg0: i32) -> (i32, i32) {
    %c0_i32 = arith.constant 0 : i32
    %c0_i32_0 = arith.constant 0 : i32
    %c0_i32_1 = arith.constant 0 : i32
    return %c0_i32, %c0_i32_0 : i32, i32
  }
  func.func @transform_4(%arg0: i32) -> (i32, i32) {
    %c0_i32 = arith.constant 0 : i32
    %c0_i32_0 = arith.constant 0 : i32
    %c0_i32_1 = arith.constant 0 : i32
    return %c0_i32, %c0_i32_0 : i32, i32
  }
  func.func @transform_5(%arg0: i32) -> (i32, i32) {
    %c0_i32 = arith.constant 0 : i32
    %c0_i32_0 = arith.constant 0 : i32
    %c0_i32_1 = arith.constant 0 : i32
    return %c0_i32, %c0_i32_0 : i32, i32
  }
  func.func @transform_6(%arg0: i32) -> (i32, i32) {
    %c0_i32 = arith.constant 0 : i32
    %c0_i32_0 = arith.constant 0 : i32
    %c0_i32_1 = arith.constant 0 : i32
    return %c0_i32, %c0_i32_0 : i32, i32
  }
  func.func @transform_7(%arg0: i32) -> (i32, i32) {
    %c0_i32 = arith.constant 0 : i32
    %c0_i32_0 = arith.constant 0 : i32
    return %arg0, %c0_i32 : i32, i32
  }
}

</mosaic_0001>

<bundles_post_ra>
// kernel: tpu_custom_call.1
= control target key start
LH: loop header
LB: loop body
LE: loop exit
PB: predicated region body
PF: predicated region fallthrough
CT: control target
= control target key end

     0   :  { %s513_s0 = inlined_call_operand.hbm [shape: f32[16,128], index: 0, kind: input, shape index: {}]   ;;  %s514_s1 = inlined_call_operand.hbm [shape: bf16[128,128], index: 1, kind: input, shape index: {}]   ;;  %s515_s2 = inlined_call_operand.vmem [shape: f32[1,128], index: 2, kind: input, shape index: {}]   ;;  %s516_s3 = inlined_call_operand.hbm [shape: bf16[128,128], index: 3, kind: input, shape index: {}]   ;;  %s517_s4 = inlined_call_operand.vmem [shape: f32[1,128], index: 4, kind: input, shape index: {}]   ;;  %s518_s5 = inlined_call_operand.vmem [shape: f32[1,128], index: 5, kind: input, shape index: {}]   ;;  %s519_s6 = inlined_call_operand.<no memory space> [shape: f32[1,1], index: 6, kind: input, shape index: {}]   ;;  %s520_s7 = inlined_call_operand.vmem [shape: f32[16,1], index: 7, kind: output, shape index: {}]  }
   0x1   :  { %v12_v0 = vstv %s519_s6 }
   0x2   :  { %13 = vst [vmem:[#allocation2] sm:$0x1] %v12_v0 }
   0x3   :  { %14 = vsyncpa [#allocation4], 0 }
   0x4   :  { %15 = vsyncpa [#allocation6], 0  ;;  %s33_s28 = sshll.u32 %s514_s1, 4  ;;  %s439_s29 = smov [#allocation5]   ;;  %s34_s28 = int_to_ptr.hbm [resolvable:$true] %s33_s28 }
   0x5   :  { %s35_s30 = sshll.u32 %s439_s29, 4  ;;  %s20_s10 = sshll.u32 %s513_s0, 4  ;;  %s36_s30 = int_to_ptr.vmem [resolvable:$true] %s35_s30  ;;  %s21_s10 = int_to_ptr.hbm [resolvable:$true] %s20_s10 }
   0x6   :  { %s440_s11 = smov 64   ;;  %s441_s12 = smov 4  }
   0x7   :  { %41 = dma.hbm_to_vmem [thread:$0]  %s34_s28, 1024, %s36_s30, [#allocation6], %s440_s11, %s440_s11, %s441_s12  }
   0x8   :  { %s442_s6 = smov [#allocation3]   ;;  %s443_s14 = smov 128  }
   0x9   :  { %s22_s13 = sshll.u32 %s442_s6, 4  ;;  %s444_s15 = smov 8   ;;  %s23_s13 = int_to_ptr.vmem [resolvable:$true] %s22_s13 }
   0xa   :  { %28 = dma.hbm_to_vmem [thread:$0]  %s21_s10, 256, %s23_s13, [#allocation4], %s443_s14, %s443_s14, %s444_s15  }
   0xb   :  { %s48_s17 = sshll.u32 %s516_s3, 4  ;;  %s445_s18 = smov [#allocation7]   ;;  %s49_s17 = int_to_ptr.hbm [resolvable:$true] %s48_s17 }
   0xc   :  { %s50_s19 = sshll.u32 %s445_s18, 4  ;;  %s51_s19 = int_to_ptr.vmem [resolvable:$true] %s50_s19 }
   0xd   :  { %56 = dma.hbm_to_vmem [thread:$0]  %s49_s17, 1024, %s51_s19, [#allocation6], %s440_s11, %s440_s11, %s441_s12  }
   0xe   :  { %435 = dma.done.wait [#allocation4], 256  }
   0xf   :  { %436 = vsyncadd [#allocation4], 4294967040 }
  0x10   :  { %437 = dma.done.wait [#allocation6], 2048  }
  0x11   :  { %438 = vsyncadd [#allocation6], 4294965248  ;;  %v343_v1 = vld [vmem:[#allocation5 + $0x38] sm:$0xff]  ;;  %v342_v2 = vld [vmem:[#allocation5 + $0x30] sm:$0xff]  ;;  %vm263_vm0 = vcmask 7168  }
  0x12   :  { %146 = vmatpush.bf16.msra.mxu0 %v343_v1  ;;  %v351_v3 = vld [vmem:[#allocation7 + $0x38] sm:$0xff]  ;;  %v350_v4 = vld [vmem:[#allocation7 + $0x30] sm:$0xff]  ;;  %v341_v5 = vld [vmem:[#allocation5 + $0x28] sm:$0xff] }
  0x13   :  { %231 = vmatpush.bf16.msra.mxu1 %v351_v3  ;;  %v349_v6 = vld [vmem:[#allocation7 + $0x28] sm:$0xff]  ;;  %v340_v7 = vld [vmem:[#allocation5 + $0x20] sm:$0xff]  ;;  %v339_v9 = vld [vmem:[#allocation5 + $0x18] sm:$0xff] }
  0x14   :  { %v348_v8 = vld [vmem:[#allocation7 + $0x20] sm:$0xff]  ;;  %v338_v10 = vld [vmem:[#allocation5 + $0x10] sm:$0xff]  ;;  %v337_v11 = vld [vmem:[#allocation5 + $0x8] sm:$0xff] }
  0x15   :  { %v336_v12 = vld [vmem:[#allocation5] sm:$0xff]  ;;  %v75_v13 = vld [vmem:[#allocation3] sm:$0xff]  ;;  %v76_v14 = vld [vmem:[#allocation3 + $0x8] sm:$0xff] }
  0x16   :  { %147 = vmatpush.bf16.msra.mxu0 %v342_v2  ;;  %v77_v15 = vpack.c.bf16 %v76_v14, %v75_v13  ;;  %v347_v16 = vld [vmem:[#allocation7 + $0x18] sm:$0xff]  ;;  %v346_v17 = vld [vmem:[#allocation7 + $0x10] sm:$0xff]  ;;  %v345_v18 = vld [vmem:[#allocation7 + $0x8] sm:$0xff] }
  0x17   :  { %232 = vmatpush.bf16.msra.mxu1 %v350_v4  ;;  %v344_v19 = vld [vmem:[#allocation7] sm:$0xff]  ;;  %v359_v21 = vld [vmem:[%s515_s2] ss:$0 sm:$0xff] }
  0x18   :  { %v360_v28 = vld [vmem:[%s517_s4] ss:$0 sm:$0xff] }
  0x19   :  { %v361_v31 = vld [vmem:[%s518_s5] ss:$0 sm:$0xff] }
  0x1a   :  { %148 = vmatpush.bf16.msra.mxu0 %v341_v5  ;;  %v362_v38 = vld [vmem:[#allocation2] ss:$0 sm:$0xff] }
  0x1b   :  { %233 = vmatpush.bf16.msra.mxu1 %v349_v6 }
  0x1e   :  { %149 = vmatpush.bf16.msra.mxu0 %v340_v7 }
  0x1f   :  { %234 = vmatpush.bf16.msra.mxu1 %v348_v8 }
  0x22   :  { %150 = vmatpush.bf16.msra.mxu0 %v339_v9 }
  0x23   :  { %235 = vmatpush.bf16.msra.mxu1 %v347_v16 }
  0x26   :  { %151 = vmatpush.bf16.msra.mxu0 %v338_v10 }
  0x27   :  { %236 = vmatpush.bf16.msra.mxu1 %v346_v17 }
  0x2a   :  { %152 = vmatpush.bf16.msra.mxu0 %v337_v11 }
  0x2b   :  { %237 = vmatpush.bf16.msra.mxu1 %v345_v18 }
  0x2e   :  { %153 = vmatpush.bf16.msra.mxu0 %v336_v12 }
  0x2f   :  { %238 = vmatpush.bf16.msra.mxu1 %v344_v19 }
  0x31   :  { %154 = vmatmul.bf16.vlgmr.msra.gmra.mxu0 %v77_v15 }
  0xae   :  { %v155_v20 = vpop.f32.mrf.mxu0 }
  0xaf   :  { %v156_v22 = vadd.f32 %v359_v21, %v155_v20 }
  0xb1   :  { %v160_v25 = vmax.f32 %v156_v22, 0.0 }
  0xb6   :  { %v157_v23 = vpop.f32.mrf.mxu0 }
  0xb7   :  { %v158_v24 = vadd.f32 %v359_v21, %v157_v23 }
  0xb9   :  { %v161_v26 = vmax.f32 %v158_v24, 0.0 }
  0xbb   :  { %v162_v27 = vpack.c.bf16 %v161_v26, %v160_v25 }
  0xbd   :  { %239 = vmatmul.bf16.vlgmr.msra.gmra.mxu1 %v162_v27 }
 0x13a   :  { %v240_v29 = vpop.f32.mrf.mxu1 }
 0x13b   :  { %v241_v30 = vadd.f32 %v360_v28, %v240_v29 }
 0x13d   :  { %v245_v32 = vmax.f32 %v241_v30, 0.0 }
 0x13f   :  { %v251_v33 = vmul.f32 %v361_v31, %v245_v32 }
 0x141   :  { %253 = vadd.xlane.f32.xlu0 %v251_v33 }
 0x142   :  { %v242_v34 = vpop.f32.mrf.mxu1 }
 0x143   :  { %v243_v35 = vadd.f32 %v360_v28, %v242_v34 }
 0x145   :  { %v246_v36 = vmax.f32 %v243_v35, 0.0 }
 0x147   :  { %v252_v37 = vmul.f32 %v361_v31, %v246_v36 }
 0x149   :  { %255 = vadd.xlane.f32.xlu0 %v252_v37 }
 0x1b4   :  { %v254_v39 = vpop.xlane.xlu0 %253 }
 0x1b5   :  { %v261_v40 = vadd.f32 %v362_v38, %v254_v39 }
 0x1b7   :  { %264 = vst.msk [vmem:[%s520_s7] sm:$0xff] %vm263_vm0, %v261_v40 }
 0x1bc   :  { %v256_v41 = vpop.xlane.xlu0 %255 }
 0x1bd   :  { %v262_v42 = vadd.f32 %v362_v38, %v256_v41 }
 0x1bf   :  { %265 = vst.msk [vmem:[%s520_s7 + $0x8] sm:$0xff] %vm263_vm0, %v262_v42 }
 0x1c0   :  { %270 = vsyncpa [#allocation4], 1 }
 0x1c1   :  { %271 = vsyncpa [#allocation6], 1 }

// kernel: tpu_custom_call.1
= control target key start
LH: loop header
LB: loop body
LE: loop exit
PB: predicated region body
PF: predicated region fallthrough
CT: control target
= control target key end

     0   :  { %s513_s0 = inlined_call_operand.hbm [shape: f32[16,128], index: 0, kind: input, shape index: {}]   ;;  %s514_s1 = inlined_call_operand.hbm [shape: bf16[128,128], index: 1, kind: input, shape index: {}]   ;;  %s515_s2 = inlined_call_operand.vmem [shape: f32[1,128], index: 2, kind: input, shape index: {}]   ;;  %s516_s3 = inlined_call_operand.hbm [shape: bf16[128,128], index: 3, kind: input, shape index: {}]   ;;  %s517_s4 = inlined_call_operand.vmem [shape: f32[1,128], index: 4, kind: input, shape index: {}]   ;;  %s518_s5 = inlined_call_operand.vmem [shape: f32[1,128], index: 5, kind: input, shape index: {}]   ;;  %s519_s6 = inlined_call_operand.<no memory space> [shape: f32[1,1], index: 6, kind: input, shape index: {}]   ;;  %s520_s7 = inlined_call_operand.vmem [shape: f32[16,1], index: 7, kind: output, shape index: {}]  }
   0x1   :  { %v12_v0 = vstv %s519_s6 }
   0x2   :  { %13 = vst [vmem:[#allocation2] sm:$0x1] %v12_v0 }
   0x3   :  { %14 = vsyncpa [#allocation4], 0 }
   0x4   :  { %15 = vsyncpa [#allocation6], 0  ;;  %s33_s28 = sshll.u32 %s514_s1, 4  ;;  %s439_s29 = smov [#allocation5]   ;;  %s34_s28 = int_to_ptr.hbm [resolvable:$true] %s33_s28 }
   0x5   :  { %s35_s30 = sshll.u32 %s439_s29, 4  ;;  %s20_s10 = sshll.u32 %s513_s0, 4  ;;  %s36_s30 = int_to_ptr.vmem [resolvable:$true] %s35_s30  ;;  %s21_s10 = int_to_ptr.hbm [resolvable:$true] %s20_s10 }
   0x6   :  { %s440_s11 = smov 64   ;;  %s441_s12 = smov 4  }
   0x7   :  { %41 = dma.hbm_to_vmem [thread:$0]  %s34_s28, 1024, %s36_s30, [#allocation6], %s440_s11, %s440_s11, %s441_s12  }
   0x8   :  { %s442_s6 = smov [#allocation3]   ;;  %s443_s14 = smov 128  }
   0x9   :  { %s22_s13 = sshll.u32 %s442_s6, 4  ;;  %s444_s15 = smov 8   ;;  %s23_s13 = int_to_ptr.vmem [resolvable:$true] %s22_s13 }
   0xa   :  { %28 = dma.hbm_to_vmem [thread:$0]  %s21_s10, 256, %s23_s13, [#allocation4], %s443_s14, %s443_s14, %s444_s15  }
   0xb   :  { %s48_s17 = sshll.u32 %s516_s3, 4  ;;  %s445_s18 = smov [#allocation7]   ;;  %s49_s17 = int_to_ptr.hbm [resolvable:$true] %s48_s17 }
   0xc   :  { %s50_s19 = sshll.u32 %s445_s18, 4  ;;  %s51_s19 = int_to_ptr.vmem [resolvable:$true] %s50_s19 }
   0xd   :  { %56 = dma.hbm_to_vmem [thread:$0]  %s49_s17, 1024, %s51_s19, [#allocation6], %s440_s11, %s440_s11, %s441_s12  }
   0xe   :  { %435 = dma.done.wait [#allocation4], 256  }
   0xf   :  { %436 = vsyncadd [#allocation4], 4294967040 }
  0x10   :  { %437 = dma.done.wait [#allocation6], 2048  }
  0x11   :  { %438 = vsyncadd [#allocation6], 4294965248  ;;  %v343_v1 = vld [vmem:[#allocation5 + $0x38] sm:$0xff]  ;;  %v342_v2 = vld [vmem:[#allocation5 + $0x30] sm:$0xff]  ;;  %vm263_vm0 = vcmask 7168  }
  0x12   :  { %146 = vmatpush.bf16.msra.mxu0 %v343_v1  ;;  %v351_v3 = vld [vmem:[#allocation7 + $0x38] sm:$0xff]  ;;  %v350_v4 = vld [vmem:[#allocation7 + $0x30] sm:$0xff]  ;;  %v341_v5 = vld [vmem:[#allocation5 + $0x28] sm:$0xff] }
  0x13   :  { %231 = vmatpush.bf16.msra.mxu1 %v351_v3  ;;  %v349_v6 = vld [vmem:[#allocation7 + $0x28] sm:$0xff]  ;;  %v340_v7 = vld [vmem:[#allocation5 + $0x20] sm:$0xff]  ;;  %v339_v9 = vld [vmem:[#allocation5 + $0x18] sm:$0xff] }
  0x14   :  { %v348_v8 = vld [vmem:[#allocation7 + $0x20] sm:$0xff]  ;;  %v338_v10 = vld [vmem:[#allocation5 + $0x10] sm:$0xff]  ;;  %v337_v11 = vld [vmem:[#allocation5 + $0x8] sm:$0xff] }
  0x15   :  { %v336_v12 = vld [vmem:[#allocation5] sm:$0xff]  ;;  %v75_v13 = vld [vmem:[#allocation3] sm:$0xff]  ;;  %v76_v14 = vld [vmem:[#allocation3 + $0x8] sm:$0xff] }
  0x16   :  { %147 = vmatpush.bf16.msra.mxu0 %v342_v2  ;;  %v77_v15 = vpack.c.bf16 %v76_v14, %v75_v13  ;;  %v347_v16 = vld [vmem:[#allocation7 + $0x18] sm:$0xff]  ;;  %v346_v17 = vld [vmem:[#allocation7 + $0x10] sm:$0xff]  ;;  %v345_v18 = vld [vmem:[#allocation7 + $0x8] sm:$0xff] }
  0x17   :  { %232 = vmatpush.bf16.msra.mxu1 %v350_v4  ;;  %v344_v19 = vld [vmem:[#allocation7] sm:$0xff]  ;;  %v359_v21 = vld [vmem:[%s515_s2] ss:$0 sm:$0xff] }
  0x18   :  { %v360_v28 = vld [vmem:[%s517_s4] ss:$0 sm:$0xff] }
  0x19   :  { %v361_v31 = vld [vmem:[%s518_s5] ss:$0 sm:$0xff] }
  0x1a   :  { %148 = vmatpush.bf16.msra.mxu0 %v341_v5  ;;  %v362_v38 = vld [vmem:[#allocation2] ss:$0 sm:$0xff] }
  0x1b   :  { %233 = vmatpush.bf16.msra.mxu1 %v349_v6 }
  0x1e   :  { %149 = vmatpush.bf16.msra.mxu0 %v340_v7 }
  0x1f   :  { %234 = vmatpush.bf16.msra.mxu1 %v348_v8 }
  0x22   :  { %150 = vmatpush.bf16.msra.mxu0 %v339_v9 }
  0x23   :  { %235 = vmatpush.bf16.msra.mxu1 %v347_v16 }
  0x26   :  { %151 = vmatpush.bf16.msra.mxu0 %v338_v10 }
  0x27   :  { %236 = vmatpush.bf16.msra.mxu1 %v346_v17 }
  0x2a   :  { %152 = vmatpush.bf16.msra.mxu0 %v337_v11 }
  0x2b   :  { %237 = vmatpush.bf16.msra.mxu1 %v345_v18 }
  0x2e   :  { %153 = vmatpush.bf16.msra.mxu0 %v336_v12 }
  0x2f   :  { %238 = vmatpush.bf16.msra.mxu1 %v344_v19 }
  0x31   :  { %154 = vmatmul.bf16.vlgmr.msra.gmra.mxu0 %v77_v15 }
  0xae   :  { %v155_v20 = vpop.f32.mrf.mxu0 }
  0xaf   :  { %v156_v22 = vadd.f32 %v359_v21, %v155_v20 }
  0xb1   :  { %v160_v25 = vmax.f32 %v156_v22, 0.0 }
  0xb6   :  { %v157_v23 = vpop.f32.mrf.mxu0 }
  0xb7   :  { %v158_v24 = vadd.f32 %v359_v21, %v157_v23 }
  0xb9   :  { %v161_v26 = vmax.f32 %v158_v24, 0.0 }
  0xbb   :  { %v162_v27 = vpack.c.bf16 %v161_v26, %v160_v25 }
  0xbd   :  { %239 = vmatmul.bf16.vlgmr.msra.gmra.mxu1 %v162_v27 }
 0x13a   :  { %v240_v29 = vpop.f32.mrf.mxu1 }
 0x13b   :  { %v241_v30 = vadd.f32 %v360_v28, %v240_v29 }
 0x13d   :  { %v245_v32 = vmax.f32 %v241_v30, 0.0 }
 0x13f   :  { %v251_v33 = vmul.f32 %v361_v31, %v245_v32 }
 0x141   :  { %253 = vadd.xlane.f32.xlu0 %v251_v33 }
 0x142   :  { %v242_v34 = vpop.f32.mrf.mxu1 }
 0x143   :  { %v243_v35 = vadd.f32 %v360_v28, %v242_v34 }
 0x145   :  { %v246_v36 = vmax.f32 %v243_v35, 0.0 }
 0x147   :  { %v252_v37 = vmul.f32 %v361_v31, %v246_v36 }
 0x149   :  { %255 = vadd.xlane.f32.xlu0 %v252_v37 }
 0x1b4   :  { %v254_v39 = vpop.xlane.xlu0 %253 }
 0x1b5   :  { %v261_v40 = vadd.f32 %v362_v38, %v254_v39 }
 0x1b7   :  { %264 = vst.msk [vmem:[%s520_s7] sm:$0xff] %vm263_vm0, %v261_v40 }
 0x1bc   :  { %v256_v41 = vpop.xlane.xlu0 %255 }
 0x1bd   :  { %v262_v42 = vadd.f32 %v362_v38, %v256_v41 }
 0x1bf   :  { %265 = vst.msk [vmem:[%s520_s7 + $0x8] sm:$0xff] %vm263_vm0, %v262_v42 }
 0x1c0   :  { %270 = vsyncpa [#allocation4], 1 }
 0x1c1   :  { %271 = vsyncpa [#allocation6], 1 }

</bundles_post_ra>
